<compile_context>
chip_gen: v7x
topology: tpu7x:2x2x1
jax: 0.10.0
libtpu: 0.0.40
codegen_flags: <defaults>
</compile_context>

<pallas_src>
import functools

import jax
import jax.numpy as jnp
from jax import lax
from jax.experimental import pallas as pl
from jax.experimental.pallas import tpu as pltpu

LN_EPS = 1e-5   # torch.nn.LayerNorm default
OH_DIM = 29     # task='node' one-hot width from the original module


# ----------------------------------------------------------------------------- fused kernel
def _layer_norm(h, gamma, beta):
  # Single-pass E[x] / E[x^2] formulation (both lane reductions independent).
  mean = jnp.mean(h, axis=-1, keepdims=True)
  mean_sq = jnp.mean(h * h, axis=-1, keepdims=True)
  var = jnp.maximum(mean_sq - mean * mean, 0.0)
  return (h - mean) * lax.rsqrt(var + LN_EPS) * gamma + beta


def fused_gnn_kernel(mask_ref,                    # VMEM [N,1] int32
                     a_ref, x_ref,                # VMEM [N,N], [N,Din]
                     w0_ref,                      # VMEM [Din,H]   (conv 0 weight)
                     wstack_ref,                  # VMEM [4,H,H]   (conv1, conv2, mp_w1_x, mp_w2 padded)
                     w1oh_ref,                    # VMEM [29,H]    (one-hot part of mp_w1)
                     vec_ref,                     # VMEM [9,H]     (b0,b1,b2,g0,be0,g1,be1,mp_b1,mp_b2pad)
                     out_ref,                     # VMEM [N,slab]  lane-dense output slab
                     *, out_dim):
  n = a_ref.shape[0]
  hidden = wstack_ref.shape[-1]

  a = a_ref[...]

  # Packed 1-row parameters (static sublane slices, no runtime cost).
  b0, b1, b2 = vec_ref[0:1, :], vec_ref[1:2, :], vec_ref[2:3, :]
  g0, be0 = vec_ref[3:4, :], vec_ref[4:5, :]
  g1, be1 = vec_ref[5:6, :], vec_ref[6:7, :]
  mpb1, mpb2 = vec_ref[7:8, :], vec_ref[8:9, :]

  # ---- layer 0: GCNConv -> ReLU -> Dropout(eval=id) -> LayerNorm
  xw = jnp.dot(x_ref[...], w0_ref[...], preferred_element_type=jnp.float32)
  h = jnp.dot(a, xw, preferred_element_type=jnp.float32) + b0
  h = jnp.maximum(h, 0.0)
  h = _layer_norm(h, g0, be0)

  # ---- layer 1
  xw = jnp.dot(h, wstack_ref[0], preferred_element_type=jnp.float32)
  h = jnp.dot(a, xw, preferred_element_type=jnp.float32) + b1
  h = jnp.maximum(h, 0.0)
  h = _layer_norm(h, g1, be1)

  # ---- layer 2 (no LayerNorm); its conv output is `emb`
  xw = jnp.dot(h, wstack_ref[1], preferred_element_type=jnp.float32)
  conv = jnp.dot(a, xw, preferred_element_type=jnp.float32) + b2
  h = jnp.maximum(conv, 0.0)
  # F.dropout(p=0.25, training=False) -> identity in eval mode.

  # ---- one-hot, vectorized.  torch: oh = zeros(N, 29); oh.scatter_(1,
  # mask.unsqueeze(0), 1) writes only row 0 (bug-for-bug match), setting column
  # mask[j] = 1 for every node j.  One VPU compare + one XLU sublane max-reduce.
  lane29 = lax.broadcasted_iota(jnp.int32, (n, OH_DIM), 1)
  hits = (lane29 == mask_ref[...]).astype(jnp.float32)          # (N, 29)
  oh = jnp.max(hits, axis=0, keepdims=True)                     # (1, 29)
  oh_contrib = jnp.dot(oh, w1oh_ref[...], preferred_element_type=jnp.float32)  # (1, H)

  # ---- post_mp head: Linear -> Dropout(eval=id) -> Linear -> log_softmax
  h1 = jnp.dot(h, wstack_ref[2], preferred_element_type=jnp.float32) + mpb1
  is_row0 = lax.broadcasted_iota(jnp.int32, (n, 1), 0) == 0
  h1 = jnp.where(is_row0, h1 + oh_contrib, h1)                  # row-0-only correction

  # Logits computed at padded width `hidden` (mp_w2 zero-padded); lanes >= out_dim
  # are masked before the softmax.
  logits = jnp.dot(h1, wstack_ref[3], preferred_element_type=jnp.float32) + mpb2
  lane_h = lax.broadcasted_iota(jnp.int32, (n, hidden), 1)
  logits = jnp.where(lane_h < out_dim, logits, -1e30)
  m = jnp.max(logits, axis=-1, keepdims=True)
  z = logits - m
  lse = jnp.log(jnp.sum(jnp.exp(z), axis=-1, keepdims=True))
  logp = z - lse                                                # valid in lanes [:out_dim]

  # ---- single lane-dense store: [ emb | logp (H-wide) | zero pad ]
  parts = [conv, logp]
  pad_w = out_ref.shape[-1] - 2 * hidden
  if pad_w:
    parts.append(jnp.zeros((n, pad_w), jnp.float32))
  out_ref[...] = jnp.concatenate(parts, axis=-1)


# ----------------------------------------------------------------------------- wrappers
def pack_params(params):
  """One-time packing of the many tiny parameters into few VMEM-friendly arrays."""
  hidden = params["conv_w"][1].shape[0]
  out_dim = params["mp_w2"].shape[1]
  w1_x = params["mp_w1"][:hidden]                                # (H, H)
  w1_oh = params["mp_w1"][hidden:]                               # (29, H)
  w2_pad = jnp.zeros((hidden, hidden), jnp.float32).at[:, :out_dim].set(params["mp_w2"])
  wstack = jnp.stack([params["conv_w"][1], params["conv_w"][2], w1_x, w2_pad])   # (4,H,H)
  b2_pad = jnp.zeros((hidden,), jnp.float32).at[:out_dim].set(params["mp_b2"])
  vecstack = jnp.stack([
      params["conv_b"][0], params["conv_b"][1], params["conv_b"][2],
      params["ln_g"][0], params["ln_b"][0], params["ln_g"][1], params["ln_b"][1],
      params["mp_b1"], b2_pad,
  ])                                                              # (9, H)
  return {"w0": params["conv_w"][0], "wstack": wstack,
          "w1_oh": w1_oh, "vecstack": vecstack}


@functools.partial(jax.jit, static_argnames=("out_dim",))
def gnn_stack_forward_batched(packed, x, a_hat, mask, *, out_dim):
  """Batched GNNStack forward (eval): x (G,N,Din), a_hat (G,N,N), mask (G,N)."""
  num_graphs, n, din = x.shape
  hidden = packed["wstack"].shape[-1]
  slab_w = max(128, ((2 * hidden + 127) // 128) * 128)            # lane-dense output slab
  mask3 = mask.astype(jnp.int32)[..., None]                       # (G, N, 1)

  kernel = functools.partial(fused_gnn_kernel, out_dim=out_dim)
  slab = pl.pallas_call(
      kernel,
      grid=(num_graphs,),
      out_shape=jax.ShapeDtypeStruct((num_graphs, n, slab_w), jnp.float32),
      in_specs=[
          pl.BlockSpec((None, n, 1), lambda g: (g, 0, 0)),        # mask
          pl.BlockSpec((None, n, n), lambda g: (g, 0, 0)),        # a_hat
          pl.BlockSpec((None, n, din), lambda g: (g, 0, 0)),      # x
          pl.BlockSpec(packed["w0"].shape, lambda g: (0, 0)),     # conv_w[0]
          pl.BlockSpec(packed["wstack"].shape, lambda g: (0, 0, 0)),
          pl.BlockSpec(packed["w1_oh"].shape, lambda g: (0, 0)),
          pl.BlockSpec(packed["vecstack"].shape, lambda g: (0, 0)),
      ],
      out_specs=pl.BlockSpec((None, n, slab_w), lambda g: (g, 0, 0)),
      compiler_params=pltpu.CompilerParams(dimension_semantics=("parallel",)),
  )(mask3, a_hat, x, packed["w0"], packed["wstack"], packed["w1_oh"],
    packed["vecstack"])

  emb = slab[:, :, :hidden]
  logp = slab[:, :, hidden:hidden + out_dim]
  return emb, logp


def gnn_stack_forward(packed, x, a_hat, mask, *, out_dim):
  """Module-equivalent single-graph forward (one `data` object) == G=1 batch."""
  emb, logp = gnn_stack_forward_batched(packed, x[None], a_hat[None], mask[None],
                                        out_dim=out_dim)
  return emb[0], logp[0]


# ----------------------------------------------------------------------------- glue
def gcn_normalized_adjacency(edge_index, num_nodes):
  """Dense GCN-normalized adjacency: D^{-1/2} (A + I) D^{-1/2} (gcn_norm w/ self-loops).

  For a static graph this is computed once and reused for every forward.
  """
  src, dst = edge_index[0], edge_index[1]
  a = jnp.zeros((num_nodes, num_nodes), jnp.float32).at[dst, src].add(1.0)
  a = a + jnp.eye(num_nodes, dtype=jnp.float32)          # add self-loops
  deg = jnp.sum(a, axis=1)
  dinv = jnp.where(deg > 0, lax.rsqrt(deg), 0.0)
  return dinv[:, None] * a * dinv[None, :]


def init_params(key, input_dim, hidden_dim, output_dim):
  """Deterministic synthetic parameters with the shapes GNNStack.__init__ implies."""
  ks = jax.random.split(key, 16)
  k = iter(ks)

  def lin(kk, din, dout, scale=0.1):
    return scale * jax.random.normal(kk, (din, dout), jnp.float32)

  params = {}
  dims = [(input_dim, hidden_dim), (hidden_dim, hidden_dim), (hidden_dim, hidden_dim)]
  params["conv_w"] = [lin(next(k), di, do) for di, do in dims]           # GCNConv lin weight
  params["conv_b"] = [0.05 * jax.random.normal(next(k), (do,)) for _, do in dims]
  params["ln_g"] = [jnp.ones((hidden_dim,), jnp.float32)] * 2            # LayerNorm default affine
  params["ln_b"] = [jnp.zeros((hidden_dim,), jnp.float32)] * 2
  # post_mp for task='node': Linear(hidden+29, hidden), Linear(hidden, output_dim)
  params["mp_w1"] = lin(next(k), hidden_dim + OH_DIM, hidden_dim)
  params["mp_b1"] = 0.05 * jax.random.normal(next(k), (hidden_dim,))
  params["mp_w2"] = lin(next(k), hidden_dim, output_dim)
  params["mp_b2"] = 0.05 * jax.random.normal(next(k), (output_dim,))
  return params


# ----------------------------------------------------------------------------- reference (pure JAX)
def gnn_stack_reference(params, x, a_hat, mask, num_layers=3):
  n = x.shape[0]
  emb = None
  for i in range(num_layers):
    conv = a_hat @ (x @ params["conv_w"][i]) + params["conv_b"][i]
    emb = conv
    h = jnp.maximum(conv, 0.0)
    if i != num_layers - 1:
      mu = jnp.mean(h, axis=-1, keepdims=True)
      var = jnp.mean((h - mu) ** 2, axis=-1, keepdims=True)
      h = (h - mu) / jnp.sqrt(var + LN_EPS) * params["ln_g"][i] + params["ln_b"][i]
    x = h
  oh = jnp.zeros((n, OH_DIM), jnp.float32).at[0, mask].set(1.0)
  x = jnp.concatenate([x, oh], axis=1)
  h = x @ params["mp_w1"] + params["mp_b1"]
  logits = h @ params["mp_w2"] + params["mp_b2"]
  return emb, jax.nn.log_softmax(logits, axis=1)


# ----------------------------------------------------------------------------- main
if __name__ == "__main__":
  N, INPUT_DIM, HIDDEN_DIM, OUTPUT_DIM, NUM_GRAPHS = 16, 8, 32, 4, 4

  key = jax.random.PRNGKey(0)
  k_x, k_mask, k_params = jax.random.split(key, 3)

  x = jax.random.normal(k_x, (NUM_GRAPHS, N, INPUT_DIM), jnp.float32)
  # data.mask: one integer class index in [0, 29) per node, per graph.
  mask = jax.random.randint(k_mask, (NUM_GRAPHS, N), 0, OH_DIM, jnp.int32)

  # Deterministic graphs: per-graph ring with a different stride (both directions).
  idx = jnp.arange(N, dtype=jnp.int32)
  a_hats = []
  for g in range(NUM_GRAPHS):
    s = g + 1
    src = jnp.concatenate([idx, (idx + s) % N])
    dst = jnp.concatenate([(idx + s) % N, idx])
    edge_index = jnp.stack([src, dst], axis=0)            # [2, 2N]
    a_hats.append(gcn_normalized_adjacency(edge_index, N))
  a_hat = jnp.stack(a_hats)                                # (G, N, N), built once

  params = init_params(k_params, INPUT_DIM, HIDDEN_DIM, OUTPUT_DIM)
  packed = pack_params(params)                             # one-time parameter packing

  # Batched forward: ONE pallas_call, grid over graphs (parallel across cores).
  emb, logp = gnn_stack_forward_batched(packed, x, a_hat, mask, out_dim=OUTPUT_DIM)
  emb, logp = jax.block_until_ready((emb, logp))
  assert emb.shape == (NUM_GRAPHS, N, HIDDEN_DIM)
  assert logp.shape == (NUM_GRAPHS, N, OUTPUT_DIM)
  for g in range(NUM_GRAPHS):
    emb_r, logp_r = gnn_stack_reference(params, x[g], a_hat[g], mask[g])
    assert jnp.allclose(emb[g], emb_r, atol=1e-4, rtol=1e-4)
    assert jnp.allclose(logp[g], logp_r, atol=1e-4, rtol=1e-4)

  # Module-equivalent single-graph entry point (forward of one `data` object).
  emb1, logp1 = gnn_stack_forward(packed, x[0], a_hat[0], mask[0], out_dim=OUTPUT_DIM)
  emb1, logp1 = jax.block_until_ready((emb1, logp1))
  emb_r, logp_r = gnn_stack_reference(params, x[0], a_hat[0], mask[0])
  assert jnp.allclose(emb1, emb_r, atol=1e-4, rtol=1e-4)
  assert jnp.allclose(logp1, logp_r, atol=1e-4, rtol=1e-4)

  print("KERNEL_OK")
</pallas_src>

<mosaic_0001>
module attributes {stable_mosaic.version = 11 : i64} {
  func.func @fused_gnn_kernel(%arg0: i32, %arg1: memref<1x16x1xi32, #tpu.memory_space<vmem>>, %arg2: memref<1x16x16xf32, #tpu.memory_space<vmem>>, %arg3: memref<1x16x8xf32, #tpu.memory_space<vmem>>, %arg4: memref<8x32xf32, #tpu.memory_space<vmem>>, %arg5: memref<4x32x32xf32, #tpu.memory_space<vmem>>, %arg6: memref<29x32xf32, #tpu.memory_space<vmem>>, %arg7: memref<9x32xf32, #tpu.memory_space<vmem>>, %arg8: memref<1x16x128xf32, #tpu.memory_space<vmem>>) attributes {dimension_semantics = [#tpu.dimension_semantics<parallel>], iteration_bounds = array<i64: 4>, scalar_prefetch = 0 : i64, scratch_operands = 0 : i64, tpu.core_type = #tpu.core_type<tc>, window_params = [{transform_indices = @transform_0, window_bounds = array<i64: 1, 16, 1>}, {transform_indices = @transform_1, window_bounds = array<i64: 1, 16, 16>}, {transform_indices = @transform_2, window_bounds = array<i64: 1, 16, 8>}, {pipeline_mode = #tpu.pipeline_mode<synchronous>, transform_indices = @transform_3, window_bounds = array<i64: 8, 32>}, {pipeline_mode = #tpu.pipeline_mode<synchronous>, transform_indices = @transform_4, window_bounds = array<i64: 4, 32, 32>}, {pipeline_mode = #tpu.pipeline_mode<synchronous>, transform_indices = @transform_5, window_bounds = array<i64: 29, 32>}, {pipeline_mode = #tpu.pipeline_mode<synchronous>, transform_indices = @transform_6, window_bounds = array<i64: 9, 32>}, {transform_indices = @transform_7, window_bounds = array<i64: 1, 16, 128>}]} {
    %c0 = arith.constant 0 : index
    %c0_0 = arith.constant 0 : index
    %c0_1 = arith.constant 0 : index
    %0 = vector.load %arg2[%c0, %c0_0, %c0_1] : memref<1x16x16xf32, #tpu.memory_space<vmem>>, vector<1x16x16xf32>
    %1 = vector.shape_cast %0 : vector<1x16x16xf32> to vector<16x16xf32>
    %c0_2 = arith.constant 0 : index
    %c0_3 = arith.constant 0 : index
    %2 = vector.load %arg7[%c0_2, %c0_3] : memref<9x32xf32, #tpu.memory_space<vmem>>, vector<1x32xf32>
    %c1 = arith.constant 1 : index
    %c0_4 = arith.constant 0 : index
    %3 = vector.load %arg7[%c1, %c0_4] : memref<9x32xf32, #tpu.memory_space<vmem>>, vector<1x32xf32>
    %c2 = arith.constant 2 : index
    %c0_5 = arith.constant 0 : index
    %4 = vector.load %arg7[%c2, %c0_5] : memref<9x32xf32, #tpu.memory_space<vmem>>, vector<1x32xf32>
    %c3 = arith.constant 3 : index
    %c0_6 = arith.constant 0 : index
    %5 = vector.load %arg7[%c3, %c0_6] : memref<9x32xf32, #tpu.memory_space<vmem>>, vector<1x32xf32>
    %c4 = arith.constant 4 : index
    %c0_7 = arith.constant 0 : index
    %6 = vector.load %arg7[%c4, %c0_7] : memref<9x32xf32, #tpu.memory_space<vmem>>, vector<1x32xf32>
    %c5 = arith.constant 5 : index
    %c0_8 = arith.constant 0 : index
    %7 = vector.load %arg7[%c5, %c0_8] : memref<9x32xf32, #tpu.memory_space<vmem>>, vector<1x32xf32>
    %c6 = arith.constant 6 : index
    %c0_9 = arith.constant 0 : index
    %8 = vector.load %arg7[%c6, %c0_9] : memref<9x32xf32, #tpu.memory_space<vmem>>, vector<1x32xf32>
    %c7 = arith.constant 7 : index
    %c0_10 = arith.constant 0 : index
    %9 = vector.load %arg7[%c7, %c0_10] : memref<9x32xf32, #tpu.memory_space<vmem>>, vector<1x32xf32>
    %c8 = arith.constant 8 : index
    %c0_11 = arith.constant 0 : index
    %10 = vector.load %arg7[%c8, %c0_11] : memref<9x32xf32, #tpu.memory_space<vmem>>, vector<1x32xf32>
    %c0_12 = arith.constant 0 : index
    %c0_13 = arith.constant 0 : index
    %c0_14 = arith.constant 0 : index
    %11 = vector.load %arg3[%c0_12, %c0_13, %c0_14] : memref<1x16x8xf32, #tpu.memory_space<vmem>>, vector<1x16x8xf32>
    %12 = vector.shape_cast %11 : vector<1x16x8xf32> to vector<16x8xf32>
    %c0_15 = arith.constant 0 : index
    %c0_16 = arith.constant 0 : index
    %13 = vector.load %arg4[%c0_15, %c0_16] : memref<8x32xf32, #tpu.memory_space<vmem>>, vector<8x32xf32>
    %cst = arith.constant dense<0.000000e+00> : vector<16x32xf32>
    %14 = tpu.matmul %12, %13, %cst {dimension_numbers = #tpu.dot_dimension_numbers<[1], [0], [0], [1], [0, 0, 1, 1], [], []>} : vector<16x8xf32>, vector<8x32xf32>, vector<16x32xf32> -> vector<16x32xf32>
    %cst_17 = arith.constant dense<0.000000e+00> : vector<16x32xf32>
    %15 = tpu.matmul %1, %14, %cst_17 {dimension_numbers = #tpu.dot_dimension_numbers<[1], [0], [0], [1], [0, 0, 1, 1], [], []>} : vector<16x16xf32>, vector<16x32xf32>, vector<16x32xf32> -> vector<16x32xf32>
    %16 = vector.broadcast %2 : vector<1x32xf32> to vector<16x32xf32>
    %17 = arith.addf %15, %16 : vector<16x32xf32>
    %cst_18 = arith.constant 0.000000e+00 : f32
    %18 = vector.broadcast %cst_18 : f32 to vector<16x32xf32>
    %19 = arith.maximumf %17, %18 : vector<16x32xf32>
    %cst_19 = arith.constant dense<0.000000e+00> : vector<16xf32>
    %20 = vector.multi_reduction <add>, %19, %cst_19 [1] : vector<16x32xf32> to vector<16xf32>
    %21 = vector.shape_cast %20 : vector<16xf32> to vector<16x1xf32>
    %cst_20 = arith.constant 3.200000e+01 : f32
    %22 = vector.broadcast %cst_20 : f32 to vector<16x1xf32>
    %23 = arith.divf %21, %22 : vector<16x1xf32>
    %24 = arith.mulf %19, %19 : vector<16x32xf32>
    %cst_21 = arith.constant dense<0.000000e+00> : vector<16xf32>
    %25 = vector.multi_reduction <add>, %24, %cst_21 [1] : vector<16x32xf32> to vector<16xf32>
    %26 = vector.shape_cast %25 : vector<16xf32> to vector<16x1xf32>
    %cst_22 = arith.constant 3.200000e+01 : f32
    %27 = vector.broadcast %cst_22 : f32 to vector<16x1xf32>
    %28 = arith.divf %26, %27 : vector<16x1xf32>
    %29 = arith.mulf %23, %23 : vector<16x1xf32>
    %30 = arith.subf %28, %29 : vector<16x1xf32>
    %cst_23 = arith.constant 0.000000e+00 : f32
    %31 = vector.broadcast %cst_23 : f32 to vector<16x1xf32>
    %32 = arith.maximumf %30, %31 : vector<16x1xf32>
    %33 = vector.broadcast %23 : vector<16x1xf32> to vector<16x32xf32>
    %34 = arith.subf %19, %33 : vector<16x32xf32>
    %cst_24 = arith.constant 9.99999974E-6 : f32
    %35 = vector.broadcast %cst_24 : f32 to vector<16x1xf32>
    %36 = arith.addf %32, %35 : vector<16x1xf32>
    %37 = math.rsqrt %36 : vector<16x1xf32>
    %38 = vector.broadcast %37 : vector<16x1xf32> to vector<16x32xf32>
    %39 = arith.mulf %34, %38 : vector<16x32xf32>
    %40 = vector.broadcast %5 : vector<1x32xf32> to vector<16x32xf32>
    %41 = arith.mulf %39, %40 : vector<16x32xf32>
    %42 = vector.broadcast %6 : vector<1x32xf32> to vector<16x32xf32>
    %43 = arith.addf %41, %42 : vector<16x32xf32>
    %c0_25 = arith.constant 0 : index
    %c0_26 = arith.constant 0 : index
    %c0_27 = arith.constant 0 : index
    %44 = vector.load %arg5[%c0_25, %c0_26, %c0_27] : memref<4x32x32xf32, #tpu.memory_space<vmem>>, vector<1x32x32xf32>
    %45 = vector.shape_cast %44 : vector<1x32x32xf32> to vector<32x32xf32>
    %cst_28 = arith.constant dense<0.000000e+00> : vector<16x32xf32>
    %46 = tpu.matmul %43, %45, %cst_28 {dimension_numbers = #tpu.dot_dimension_numbers<[1], [0], [0], [1], [0, 0, 1, 1], [], []>} : vector<16x32xf32>, vector<32x32xf32>, vector<16x32xf32> -> vector<16x32xf32>
    %cst_29 = arith.constant dense<0.000000e+00> : vector<16x32xf32>
    %47 = tpu.matmul %1, %46, %cst_29 {dimension_numbers = #tpu.dot_dimension_numbers<[1], [0], [0], [1], [0, 0, 1, 1], [], []>} : vector<16x16xf32>, vector<16x32xf32>, vector<16x32xf32> -> vector<16x32xf32>
    %48 = vector.broadcast %3 : vector<1x32xf32> to vector<16x32xf32>
    %49 = arith.addf %47, %48 : vector<16x32xf32>
    %cst_30 = arith.constant 0.000000e+00 : f32
    %50 = vector.broadcast %cst_30 : f32 to vector<16x32xf32>
    %51 = arith.maximumf %49, %50 : vector<16x32xf32>
    %cst_31 = arith.constant dense<0.000000e+00> : vector<16xf32>
    %52 = vector.multi_reduction <add>, %51, %cst_31 [1] : vector<16x32xf32> to vector<16xf32>
    %53 = vector.shape_cast %52 : vector<16xf32> to vector<16x1xf32>
    %cst_32 = arith.constant 3.200000e+01 : f32
    %54 = vector.broadcast %cst_32 : f32 to vector<16x1xf32>
    %55 = arith.divf %53, %54 : vector<16x1xf32>
    %56 = arith.mulf %51, %51 : vector<16x32xf32>
    %cst_33 = arith.constant dense<0.000000e+00> : vector<16xf32>
    %57 = vector.multi_reduction <add>, %56, %cst_33 [1] : vector<16x32xf32> to vector<16xf32>
    %58 = vector.shape_cast %57 : vector<16xf32> to vector<16x1xf32>
    %cst_34 = arith.constant 3.200000e+01 : f32
    %59 = vector.broadcast %cst_34 : f32 to vector<16x1xf32>
    %60 = arith.divf %58, %59 : vector<16x1xf32>
    %61 = arith.mulf %55, %55 : vector<16x1xf32>
    %62 = arith.subf %60, %61 : vector<16x1xf32>
    %cst_35 = arith.constant 0.000000e+00 : f32
    %63 = vector.broadcast %cst_35 : f32 to vector<16x1xf32>
    %64 = arith.maximumf %62, %63 : vector<16x1xf32>
    %65 = vector.broadcast %55 : vector<16x1xf32> to vector<16x32xf32>
    %66 = arith.subf %51, %65 : vector<16x32xf32>
    %cst_36 = arith.constant 9.99999974E-6 : f32
    %67 = vector.broadcast %cst_36 : f32 to vector<16x1xf32>
    %68 = arith.addf %64, %67 : vector<16x1xf32>
    %69 = math.rsqrt %68 : vector<16x1xf32>
    %70 = vector.broadcast %69 : vector<16x1xf32> to vector<16x32xf32>
    %71 = arith.mulf %66, %70 : vector<16x32xf32>
    %72 = vector.broadcast %7 : vector<1x32xf32> to vector<16x32xf32>
    %73 = arith.mulf %71, %72 : vector<16x32xf32>
    %74 = vector.broadcast %8 : vector<1x32xf32> to vector<16x32xf32>
    %75 = arith.addf %73, %74 : vector<16x32xf32>
    %c1_37 = arith.constant 1 : index
    %c0_38 = arith.constant 0 : index
    %c0_39 = arith.constant 0 : index
    %76 = vector.load %arg5[%c1_37, %c0_38, %c0_39] : memref<4x32x32xf32, #tpu.memory_space<vmem>>, vector<1x32x32xf32>
    %77 = vector.shape_cast %76 : vector<1x32x32xf32> to vector<32x32xf32>
    %cst_40 = arith.constant dense<0.000000e+00> : vector<16x32xf32>
    %78 = tpu.matmul %75, %77, %cst_40 {dimension_numbers = #tpu.dot_dimension_numbers<[1], [0], [0], [1], [0, 0, 1, 1], [], []>} : vector<16x32xf32>, vector<32x32xf32>, vector<16x32xf32> -> vector<16x32xf32>
    %cst_41 = arith.constant dense<0.000000e+00> : vector<16x32xf32>
    %79 = tpu.matmul %1, %78, %cst_41 {dimension_numbers = #tpu.dot_dimension_numbers<[1], [0], [0], [1], [0, 0, 1, 1], [], []>} : vector<16x16xf32>, vector<16x32xf32>, vector<16x32xf32> -> vector<16x32xf32>
    %80 = vector.broadcast %4 : vector<1x32xf32> to vector<16x32xf32>
    %81 = arith.addf %79, %80 : vector<16x32xf32>
    %cst_42 = arith.constant 0.000000e+00 : f32
    %82 = vector.broadcast %cst_42 : f32 to vector<16x32xf32>
    %83 = arith.maximumf %81, %82 : vector<16x32xf32>
    %84 = tpu.iota {dimensions = array<i32: 1>} : vector<16x29xi32>
    %c0_43 = arith.constant 0 : index
    %c0_44 = arith.constant 0 : index
    %c0_45 = arith.constant 0 : index
    %85 = vector.load %arg1[%c0_43, %c0_44, %c0_45] : memref<1x16x1xi32, #tpu.memory_space<vmem>>, vector<1x16x1xi32>
    %86 = vector.shape_cast %85 : vector<1x16x1xi32> to vector<16x1xi32>
    %87 = vector.broadcast %86 : vector<16x1xi32> to vector<16x29xi32>
    %88 = arith.cmpi eq, %84, %87 : vector<16x29xi32>
    %89 = arith.extui %88 : vector<16x29xi1> to vector<16x29xi32>
    %90 = arith.sitofp %89 : vector<16x29xi32> to vector<16x29xf32>
    %cst_46 = arith.constant dense<0xFF800000> : vector<29xf32>
    %91 = vector.multi_reduction <maximumf>, %90, %cst_46 [0] : vector<16x29xf32> to vector<29xf32>
    %92 = vector.shape_cast %91 : vector<29xf32> to vector<1x29xf32>
    %c0_47 = arith.constant 0 : index
    %c0_48 = arith.constant 0 : index
    %93 = vector.load %arg6[%c0_47, %c0_48] : memref<29x32xf32, #tpu.memory_space<vmem>>, vector<29x32xf32>
    %cst_49 = arith.constant dense<0.000000e+00> : vector<1x32xf32>
    %94 = tpu.matmul %92, %93, %cst_49 {dimension_numbers = #tpu.dot_dimension_numbers<[1], [0], [0], [1], [0, 0, 1, 1], [], []>} : vector<1x29xf32>, vector<29x32xf32>, vector<1x32xf32> -> vector<1x32xf32>
    %c2_50 = arith.constant 2 : index
    %c0_51 = arith.constant 0 : index
    %c0_52 = arith.constant 0 : index
    %95 = vector.load %arg5[%c2_50, %c0_51, %c0_52] : memref<4x32x32xf32, #tpu.memory_space<vmem>>, vector<1x32x32xf32>
    %96 = vector.shape_cast %95 : vector<1x32x32xf32> to vector<32x32xf32>
    %cst_53 = arith.constant dense<0.000000e+00> : vector<16x32xf32>
    %97 = tpu.matmul %83, %96, %cst_53 {dimension_numbers = #tpu.dot_dimension_numbers<[1], [0], [0], [1], [0, 0, 1, 1], [], []>} : vector<16x32xf32>, vector<32x32xf32>, vector<16x32xf32> -> vector<16x32xf32>
    %98 = vector.broadcast %9 : vector<1x32xf32> to vector<16x32xf32>
    %99 = arith.addf %97, %98 : vector<16x32xf32>
    %100 = tpu.iota {dimensions = array<i32: 0>} : vector<16x1xi32>
    %c0_i32 = arith.constant 0 : i32
    %101 = vector.broadcast %c0_i32 : i32 to vector<16x1xi32>
    %102 = arith.cmpi eq, %100, %101 : vector<16x1xi32>
    %103 = vector.broadcast %94 : vector<1x32xf32> to vector<16x32xf32>
    %104 = arith.addf %99, %103 : vector<16x32xf32>
    %105 = vector.shape_cast %102 : vector<16x1xi1> to vector<16x1xi1>
    %106 = vector.broadcast %105 : vector<16x1xi1> to vector<16x32xi1>
    %107 = arith.select %106, %104, %99 : vector<16x32xi1>, vector<16x32xf32>
    %c3_54 = arith.constant 3 : index
    %c0_55 = arith.constant 0 : index
    %c0_56 = arith.constant 0 : index
    %108 = vector.load %arg5[%c3_54, %c0_55, %c0_56] : memref<4x32x32xf32, #tpu.memory_space<vmem>>, vector<1x32x32xf32>
    %109 = vector.shape_cast %108 : vector<1x32x32xf32> to vector<32x32xf32>
    %cst_57 = arith.constant dense<0.000000e+00> : vector<16x32xf32>
    %110 = tpu.matmul %107, %109, %cst_57 {dimension_numbers = #tpu.dot_dimension_numbers<[1], [0], [0], [1], [0, 0, 1, 1], [], []>} : vector<16x32xf32>, vector<32x32xf32>, vector<16x32xf32> -> vector<16x32xf32>
    %111 = vector.broadcast %10 : vector<1x32xf32> to vector<16x32xf32>
    %112 = arith.addf %110, %111 : vector<16x32xf32>
    %113 = tpu.iota {dimensions = array<i32: 1>} : vector<16x32xi32>
    %c4_i32 = arith.constant 4 : i32
    %114 = vector.broadcast %c4_i32 : i32 to vector<16x32xi32>
    %115 = arith.cmpi slt, %113, %114 : vector<16x32xi32>
    %cst_58 = arith.constant -1.000000e+30 : f32
    %116 = vector.broadcast %cst_58 : f32 to vector<16x32xf32>
    %117 = arith.select %115, %112, %116 : vector<16x32xi1>, vector<16x32xf32>
    %cst_59 = arith.constant dense<0xFF800000> : vector<16xf32>
    %118 = vector.multi_reduction <maximumf>, %117, %cst_59 [1] : vector<16x32xf32> to vector<16xf32>
    %119 = vector.shape_cast %118 : vector<16xf32> to vector<16x1xf32>
    %120 = vector.broadcast %119 : vector<16x1xf32> to vector<16x32xf32>
    %121 = arith.subf %117, %120 : vector<16x32xf32>
    %122 = math.exp %121 : vector<16x32xf32>
    %cst_60 = arith.constant dense<0.000000e+00> : vector<16xf32>
    %123 = vector.multi_reduction <add>, %122, %cst_60 [1] : vector<16x32xf32> to vector<16xf32>
    %124 = vector.shape_cast %123 : vector<16xf32> to vector<16x1xf32>
    %125 = math.log %124 : vector<16x1xf32>
    %126 = vector.broadcast %125 : vector<16x1xf32> to vector<16x32xf32>
    %127 = arith.subf %121, %126 : vector<16x32xf32>
    %cst_61 = arith.constant 0.000000e+00 : f32
    %128 = vector.broadcast %cst_61 : f32 to vector<16x64xf32>
    %129 = tpu.concatenate %81, %127, %128 in 1 : vector<16x32xf32>, vector<16x32xf32>, vector<16x64xf32> -> vector<16x128xf32>
    %c0_62 = arith.constant 0 : index
    %c0_63 = arith.constant 0 : index
    %c0_64 = arith.constant 0 : index
    %130 = vector.load %arg8[%c0_62, %c0_63, %c0_64] : memref<1x16x128xf32, #tpu.memory_space<vmem>>, vector<1x16x128xf32>
    %131 = vector.shape_cast %130 : vector<1x16x128xf32> to vector<16x128xf32>
    %132 = vector.shape_cast %129 : vector<16x128xf32> to vector<1x16x128xf32>
    tpu.vector_store %arg8[%c0_62, %c0_63, %c0_64], %132 {strides = array<i32>} : memref<1x16x128xf32, #tpu.memory_space<vmem>>, vector<1x16x128xf32>,
    return
  }
  func.func @transform_0(%arg0: i32) -> (i32, i32, i32) {
    %c0_i32 = arith.constant 0 : i32
    %c0_i32_0 = arith.constant 0 : i32
    %c0_i32_1 = arith.constant 0 : i32
    return %arg0, %c0_i32, %c0_i32_0 : i32, i32, i32
  }
  func.func @transform_1(%arg0: i32) -> (i32, i32, i32) {
    %c0_i32 = arith.constant 0 : i32
    %c0_i32_0 = arith.constant 0 : i32
    %c0_i32_1 = arith.constant 0 : i32
    return %arg0, %c0_i32, %c0_i32_0 : i32, i32, i32
  }
  func.func @transform_2(%arg0: i32) -> (i32, i32, i32) {
    %c0_i32 = arith.constant 0 : i32
    %c0_i32_0 = arith.constant 0 : i32
    %c0_i32_1 = arith.constant 0 : i32
    return %arg0, %c0_i32, %c0_i32_0 : i32, i32, i32
  }
  func.func @transform_3(%arg0: i32) -> (i32, i32) {
    %c0_i32 = arith.constant 0 : i32
    %c0_i32_0 = arith.constant 0 : i32
    %c0_i32_1 = arith.constant 0 : i32
    return %c0_i32, %c0_i32_0 : i32, i32
  }
  func.func @transform_4(%arg0: i32) -> (i32, i32, i32) {
    %c0_i32 = arith.constant 0 : i32
    %c0_i32_0 = arith.constant 0 : i32
    %c0_i32_1 = arith.constant 0 : i32
    %c0_i32_2 = arith.constant 0 : i32
    return %c0_i32, %c0_i32_0, %c0_i32_1 : i32, i32, i32
  }
  func.func @transform_5(%arg0: i32) -> (i32, i32) {
    %c0_i32 = arith.constant 0 : i32
    %c0_i32_0 = arith.constant 0 : i32
    %c0_i32_1 = arith.constant 0 : i32
    return %c0_i32, %c0_i32_0 : i32, i32
  }
  func.func @transform_6(%arg0: i32) -> (i32, i32) {
    %c0_i32 = arith.constant 0 : i32
    %c0_i32_0 = arith.constant 0 : i32
    %c0_i32_1 = arith.constant 0 : i32
    return %c0_i32, %c0_i32_0 : i32, i32
  }
  func.func @transform_7(%arg0: i32) -> (i32, i32, i32) {
    %c0_i32 = arith.constant 0 : i32
    %c0_i32_0 = arith.constant 0 : i32
    %c0_i32_1 = arith.constant 0 : i32
    return %arg0, %c0_i32, %c0_i32_0 : i32, i32, i32
  }
}

</mosaic_0001>

<bundles_post_ra>
// kernel: gnn_stack_forward_batched.1
= control target key start
LH: loop header
LB: loop body
LE: loop exit
PB: predicated region body
PF: predicated region fallthrough
CT: control target
= control target key end

     0   :  { %12 = vsyncpa [#allocation3], 0  ;;  %s2169_s0 = inlined_call_operand.vmem [shape: s32[4,16,1], index: 0, kind: input, shape index: {}]   ;;  %s2170_s1 = inlined_call_operand.hbm [shape: f32[4,16,16], index: 1, kind: input, shape index: {}]   ;;  %s2171_s2 = inlined_call_operand.vmem [shape: f32[4,16,8], index: 2, kind: input, shape index: {}]   ;;  %s2172_s3 = inlined_call_operand.hbm [shape: f32[8,32], index: 3, kind: input, shape index: {}]   ;;  %s2173_s4 = inlined_call_operand.vmem [shape: f32[4,32,32], index: 4, kind: input, shape index: {}]   ;;  %s2174_s5 = inlined_call_operand.vmem [shape: f32[29,32], index: 5, kind: input, shape index: {}]   ;;  %s2175_s6 = inlined_call_operand.vmem [shape: f32[9,32], index: 6, kind: input, shape index: {}]   ;;  %s2176_s7 = inlined_call_operand.vmem [shape: f32[4,16,128], index: 7, kind: output, shape index: {}]  }
   0x1   :  { %14 = vsyncpa [#allocation3 + $0x1], 0 }
   0x2   :  { %15 = vsyncpa [#allocation5], 0  ;;  %s1869_s24 = smov 0   ;;  %s1871_s25 = smov 0  }
   0x3   :  { %s1873_s26 = smov 0   ;;  %s1875_s27 = smov 0  }
   0x4 LB: > { %s1888_s28 = sadd.s32 4294967295, %s1817_s27   ;;  %s1891_s29 = sadd.s32 1, %s1817_s27   ;;  %s1817_s27 = sphi %s1875_s27, %s2194_s27   ;;  %s1813_s26 = sphi %s1873_s26, %s2193_s26   ;;  %s1809_s25 = sphi %s1871_s25, %s2192_s25   ;;  %s1805_s24 = sphi %s1869_s24, %s2191_s24  }
   0x5   : > { %s51_s30 = ssub.s32 %s1817_s27, %s1891_s29  ;;  %s54_s8 = sadd.s32 1, %s1813_s26 }
   0x6   : > { %p52_p0 = scmp.eq.s32.totalorder %s51_s30, 0  ;;  %p61_p1 = scmp.ne.s32.totalorder %s1813_s26, %s1809_s25 }
   0x7   : > { %p62_p2 = scmp.eq.s32.totalorder %s1817_s27, 0  ;;  %p67_p3 = scmp.ne.s32.totalorder %s1809_s25, %s1805_s24 }
   0x8   : > { %s1901_s9 = scalar_select %p52_p0, %s1813_s26, %s54_s8  }
   0x9   : > { %p1903_p4 = por %p62_p2, %p61_p1  ;;  %p2177_p5 = scmp.eq.s32.totalorder %s1888_s28, 0 }
   0xa   : > { %p1407_p6 = scmp.ge.s32.totalorder %s1817_s27, 1  ;;  %p214_p7 = scmp.lt.s32.totalorder %s1817_s27, 5 }
   0xb   : > { %p1912_p8 = por %p2177_p5, %p67_p3  ;;  %s1819_s13 = smov [#allocation4]  }
   0xc   : > { %p1916_p9 = pnand %p1407_p6, %p214_p7  ;;  %s227_s14 = sshll.u32 %s1819_s13, 4  ;;  %s228_s14 = int_to_ptr.vmem [resolvable:$true] %s227_s14 }
   0xd   : > { %s2182_s11 = scalar_select %p1912_p8, 1, 0 }
   0xe   : > { %s2183_s12 = scalar_select %p1916_p9, 1, 0 }
   0xf   : > { %p1651_p10 = pneg %p1916_p9  ;;  %p1660_p11 = scmp.lt.s32.totalorder %s1817_s27, 4 }
  0x10   : > { %s255_s15 = sand.u32 1, %s1813_s26   ;;  %s1721_s21 = scalar_lea.hbm %s2172_s3, 128 }
  0x11   : > { %p1926_p12 = pnand %p1651_p10, %p2177_p5  ;;  %p1932_p13 = pnand %p1660_p11, %p1903_p4 }
  0x12   : > { %s1410_s18 = sshll.u32 %s255_s15, 4  ;;  %p1722_p0 = scmp.ne.s32.totalorder %s2172_s3, %s1721_s21 }
  0x13   : > { %s2185_s17 = scalar_select %p1932_p13, 1, 0 }
  0x14   : > { %p1723_p1 = pneg %p1926_p12  ;;  %p1728_p4 = scmp.lt.u32.totalorder %s1721_s21, %s2172_s3 }
  0x16   : > { %p1724_p2 = pnand %p1723_p1, %p1722_p0 }
  0x18   : > { %p1725_p3 = pneg %p1724_p2 }
  0x1a   : > { %p1730_p6 = pnand %p1728_p4, %p1725_p3 }
  0x1c   : > { %1733 = shalt.err (!%p1730_p6)
}
  0x1d   : > { %s1734_s8 = scalar_lea.vmem %s228_s14, 128  ;;  %p1742_p5 = scmp.lt.s32.totalorder %s228_s14, %s228_s14 }
  0x1e   : > { %p1735_p7 = scmp.ne.s32.totalorder %s228_s14, %s1734_s8  ;;  %p1743_p8 = scmp.lt.s32.totalorder %s1734_s8, %s1734_s8 }
  0x20   : > { %p1737_p10 = pnand %p1735_p7, %p1723_p1  ;;  %p1744_p9 = por %p1743_p8, %p1742_p5 }
  0x22   : > { %p1738_p11 = pneg %p1737_p10 }
  0x24   : > { %p1745_p13 = pnand %p1744_p9, %p1738_p11 }
  0x26   : > { %1748 = shalt.err (!%p1745_p13)
}
  0x27   : > { %1654 = dma.hbm_to_vmem [thread:$0]  (!%p1926_p12), %s2172_s3, 128, %s228_s14, [#allocation5]  }
  0x28   : > { %s1465_s19 = sshll.u32 %s1817_s27, 8  ;;  %s259_s23 = scalar_lea.vmem [#allocation2], %s1410_s18 }
  0x29   : > { %s1956_s22 = scalar_lea.hbm %s2170_s1, %s1465_s19  ;;  %s266_s24 = sshll.u32 %s259_s23, 4  ;;  %s1958_s24 = int_to_ptr.vmem [resolvable:$true] %s266_s24 }
  0x2a   : > { %s1960_s16 = scalar_lea.sflag [#allocation3], %s255_s15  ;;  %s1749_s30 = scalar_lea.hbm %s1956_s22, 256 }
  0x2b   : > { %p1750_p5 = scmp.ne.s32.totalorder %s1956_s22, %s1749_s30  ;;  %p2186_p8 = scmp.ne.s32.totalorder %s2185_s17, 0 }
  0x2c   : > { %s1754_s8 = scalar_lea.hbm %s2170_s1, 1024  ;;  %p1755_p0 = scmp.lt.u32.totalorder %s1956_s22, %s2170_s1 }
  0x2d   : > { %p1751_p9 = pneg %p2186_p8  ;;  %p1756_p1 = scmp.lt.u32.totalorder %s1754_s8, %s1749_s30 }
  0x2e   : > { %p1758_p3 = scmp.lt.u32.totalorder %s1749_s30, %s1956_s22 }
  0x2f   : > { %p1752_p12 = pnand %p1751_p9, %p1750_p5  ;;  %p1757_p2 = por %p1756_p1, %p1755_p0 }
  0x31   : > { %p1753_p13 = pneg %p1752_p12  ;;  %p1759_p4 = por %p1758_p3, %p1757_p2 }
  0x33   : > { %p1760_p6 = pnand %p1759_p4, %p1753_p13 }
  0x35   : > { %1763 = shalt.err (!%p1760_p6)
}
  0x36   : > { %s1764_s15 = scalar_lea.vmem %s1958_s24, 256  ;;  %s1820_s18 = smov [#allocation2]  }
  0x37   : > { %p1765_p7 = scmp.ne.s32.totalorder %s1958_s24, %s1764_s15  ;;  %s1769_s19 = sshll.u32 %s1820_s18, 4  ;;  %s1770_s19 = int_to_ptr.vmem [resolvable:$false] %s1769_s19 }
  0x38   : > { %s1771_s20 = scalar_lea.vmem %s1770_s19, 512  ;;  %p1772_p5 = scmp.lt.s32.totalorder %s1958_s24, %s1770_s19 }
  0x39   : > { %p1767_p10 = pnand %p1765_p7, %p1751_p9  ;;  %p1773_p12 = scmp.lt.s32.totalorder %s1771_s20, %s1764_s15 }
  0x3b   : > { %p1768_p11 = pneg %p1767_p10  ;;  %p1774_p0 = por %p1773_p12, %p1772_p5 }
  0x3d   : > { %p1775_p1 = pnand %p1774_p0, %p1768_p11 }
  0x3f   : > { %1778 = shalt.err (!%p1775_p1)
}
  0x40   : > { %s1821_s21 = smov 128   ;;  %s1822_s23 = smov 8  }
  0x41   : > { %1658 = dma.hbm_to_vmem [thread:$0]  (!%p2186_p8), %s1956_s22, 256, %s1958_s24, %s1960_s16, %s1821_s21, %s1821_s21, %s1822_s23  }
  0x42   : > { %p2187_p9 = scmp.ne.s32.totalorder %s2183_s12, 0 }
  0x43   : > { %s288_s30 = sand.u32 (!%p2187_p9), 1, %s1809_s25   ;;  %p2188_p13 = scmp.ne.s32.totalorder (!%p2187_p9), %s2182_s11, 0 }
  0x44   : > { %286 = sbr.rel (%p2187_p9) target bundleno = 2615 (0xa37), region = 48  ;;  %s1414_s27 = sshll.u32 (!%p2187_p9), %s288_s30, 4 }
  0x45   : > { %s289_s14 = scalar_lea.sflag (!%p2187_p9), [#allocation3], %s288_s30  ;;  %s292_s8 = scalar_lea.vmem (!%p2187_p9), [#allocation2], %s1414_s27 }
  0x4b   : > { %1796 = dma.done.wait (%p2188_p13), %s289_s14, 256  }
  0x4c   : > { %1798 = vsyncadd (%p2188_p13), %s289_s14, 4294967040  ;;  %p2189_p2 = scmp.eq.s32.totalorder %s1888_s28, 0 }
  0x4e   : > { %1800 = dma.done.wait (%p2189_p2), [#allocation5], 128   ;;  %p2190_p3 = pmov %p2189_p2 }
  0x4f   : > { %p337_p8 = scmp.lt.s32.totalorder %s1888_s28, 3  ;;  %vm366_vm0 = vcmask 64512   ;;  %v365_v0 = vld [vmem:[#allocation4] sm:$0xff]  ;;  %vm452_vm1 = vcmask 130048   ;;  %v2011_v7 = vld [vmem:[%s292_s8 + $0x8] sm:$0xff]  ;;  %vm536_vm2 = vcmask 261120  }
  0x50   : > { %1802 = vsyncadd (%p2190_p3), [#allocation5], 4294967168  ;;  %1513 = vmatprep.subr.mxu1 %v365_v0  ;;  %v2007_v3 = vld [vmem:[%s292_s8] sm:$0xff]  ;;  %v583_v22 = vld [vmem:[%s2173_s4 + $0x8] sm:$0xff]  ;;  %vm992_vm3 = vcmask 1044480   ;;  %vm1825_vm4 = vmmov 1  }
  0x51   : > { %s2196_s28 = smov (!%p337_p8, %s1888_s28), 3  ;;  %1514 = vmatpush3.msra.mxu1 %v365_v0  ;;  %v1424_v8 = vld [vmem:[%s2175_s6] ss:$0 sm:$0xff]  ;;  %v584_v23 = vld [vmem:[%s2173_s4 + $0x10] sm:$0xff]  ;;  %v585_v25 = vld [vmem:[%s2173_s4 + $0x18] sm:$0xff]  ;;  %vm975_vm8 = vcmask 236544  }
  0x52   : > { %s2001_s12 = sshll.u32 %s2196_s28, 4  ;;  %v582_v21 = vld [vmem:[%s2173_s4] sm:$0xff]  ;;  %v1602_v26 = vpack.c.bf16 %v585_v25, %v584_v23  ;;  %vm1627_vm5 = vmpackc.low %vm992_vm3, %vm1825_vm4  ;;  %vm1827_vm9 = vmmov 0   ;;  %s1828_s19 = smov 32   ;;  %vm1300_vm12 = vcmask 523264  }
  0x53   : > { %s346_s24 = scalar_lea.vmem %s2171_s2, %s2001_s12  ;;  %v1598_v24 = vpack.c.bf16 %v583_v22, %v582_v21  ;;  %v1427_v45 = vld [vmem:[%s2175_s6 + $0x3] ss:$0 sm:$0xff]  ;;  %v1428_v47 = vld [vmem:[%s2175_s6 + $0x4] ss:$0 sm:$0xff]  ;;  %v1431_v58 = vld [vmem:[%s2175_s6 + $0x1] ss:$0 sm:$0xff]  ;;  %s341_s27 = scalar_lea.vmem %s2169_s0, %s2001_s12 }
  0x54   : > { %v363_v1 = vld [vmem:[%s346_s24] sm:$0xff]  ;;  %v364_v2 = vld [vmem:[%s346_s24 + $0x8] sm:$0xff]  ;;  %s351_s23 = scalar_lea.vmem %s2176_s7, %s2001_s12 }
  0x55   : > { %1515 = vmatprep.mubr.msk.f32.mxu1 %vm366_vm0, %v363_v1  ;;  %1599 = vmatprep.subr.bf16.mxu0 %v1598_v24 }
  0x56   : > { %1516 = vmatmul.mubr.msk.f32.vlgmr.msra.gmra.mrb[0].mxu1 %vm366_vm0, %v364_v2  ;;  %1601 = vmatpush3.bf16.msra.mxu0 %v1598_v24 }
  0x57   : > { %1522 = vmatprep.mubr.msk.f32.mxu1 %vm452_vm1, %v2007_v3  ;;  %1603 = vmatprep.subr.bf16.mxu0 %v1602_v26 }
  0x5a   : > { %1605 = vmatpush3.bf16.msra.mxu0 %v1602_v26 }
 0x129   : > { %v1517_v4 = vpop.f32.mrb[0].mxu1 }
 0x12a   : > { %v439_v5 = vpop.f32.mrb[1].mxu1 }
 0x12b   : > { %v1594_v6 = vpack.c.bf16 %v1517_v4, %v439_v5 }
 0x12d   : > { %1595 = vmatprep.subr.bf16.mxu1 %v1594_v6 }
 0x12e   : > { %1597 = vmatpush3.bf16.msra.mxu1 %v1594_v6 }
 0x131   : > { %1523 = vmatmul.mubr.msk.f32.vlgmr.msra.gmra.mrb[2].mxu1 %vm452_vm1, %v2011_v7 }
 0x132   : > { %1540 = vmatprep.mubr.msk.f32.mxu1 %vm452_vm1, %v2007_v3 }
 0x204   : > { %v1524_v9 = vpop.f32.mrb[2].mxu1 }
 0x205   : > { %v531_v10 = vadd.f32 %v1524_v9, %v1424_v8  ;;  %v525_v11 = vpop.f32.mrb[3].mxu1  ;;  %v1437_v9 = vld [vmem:[%s2173_s4 + $0x28] sm:$0xff] }
 0x206   : > { %v526_v12 = vadd.f32 %v1424_v8, %v525_v11  ;;  %v1436_v8 = vld [vmem:[%s2173_s4 + $0x20] sm:$0xff] }
 0x207   : > { %v535_v13 = vmax.f32 %v531_v10, 0.0  ;;  %v1438_v10 = vld [vmem:[%s2173_s4 + $0x30] sm:$0xff]  ;;  %v1610_v11 = vpack.c.bf16 %v1437_v9, %v1436_v8 }
 0x208   : > { %v534_v14 = vmax.f32 %v526_v12, 0.0  ;;  %v1439_v12 = vld [vmem:[%s2173_s4 + $0x38] sm:$0xff] }
 0x209   : > { %v547_v18 = vmul.f32 %v535_v13, %v535_v13  ;;  %v540_v19 = vsel %vm536_vm2, %v535_v13, 0.0 }
 0x20a   : > { %v537_v15 = vsel %vm536_vm2, %v534_v14, 0.0  ;;  %v546_v16 = vmul.f32 %v534_v14, %v534_v14 }
 0x20b   : > { %538 = vadd.xlane.f32.xlu0 %v537_v15  ;;  %v551_v20 = vsel %vm536_vm2, %v547_v18, 0.0 }
 0x20c   : > { %v548_v17 = vsel %vm536_vm2, %v546_v16, 0.0 }
 0x20d   : > { %549 = vadd.xlane.f32.xlu1 %v548_v17 }
 0x20f   : > { %541 = vadd.xlane.f32.xlu0 %v540_v19 }
 0x211   : > { %552 = vadd.xlane.f32.xlu1 %v551_v20 }
 0x298   : > { %v539_v27 = vpop.xlane.xlu0 %538 }
 0x299   : > { %v544_v28 = vmul.f32 0.03125, %v539_v27 }
 0x29a   : > { %v550_v29 = vpop.xlane.xlu1 %549 }
 0x29b   : > { %v556_v30 = vmul.f32 %v544_v28, %v544_v28  ;;  %v554_v31 = vmul.f32 0.03125, %v550_v29  ;;  %v562_v43 = vsub.f32 %v534_v14, %v544_v28 }
 0x29c   : > { %v542_v32 = vpop.xlane.xlu0 %541 }
 0x29d   : > { %v558_v33 = vsub.f32 %v554_v31, %v556_v30  ;;  %v545_v34 = vmul.f32 0.03125, %v542_v32 }
 0x29e   : > { %v553_v35 = vpop.xlane.xlu1 %552 }
 0x29f   : > { %v560_v36 = vmax.f32 %v558_v33, 0.0  ;;  %v557_v37 = vmul.f32 %v545_v34, %v545_v34  ;;  %v555_v38 = vmul.f32 0.03125, %v553_v35  ;;  %v563_v48 = vsub.f32 %v535_v13, %v545_v34  ;;  %v1434_v33 = vld [vmem:[%s2175_s6 + $0x5] ss:$0 sm:$0xff] }
 0x2a0   : > { %v1614_v13 = vpack.c.bf16 %v1439_v12, %v1438_v10  ;;  %v1451_v10 = vld [vmem:[%s2173_s4 + $0x50] sm:$0xff] }
 0x2a1   : > { %v564_v39 = vadd.f32 1e-05, %v560_v36  ;;  %v559_v40 = vsub.f32 %v555_v38, %v557_v37  ;;  %v1435_v37 = vld [vmem:[%s2175_s6 + $0x6] ss:$0 sm:$0xff] }
 0x2a3   : > { %1705 = vrsqrt.f32 %v564_v39  ;;  %v561_v41 = vmax.f32 %v559_v40, 0.0 }
 0x2a5   : > { %v565_v42 = vadd.f32 1e-05, %v561_v41 }
 0x2a7   : > { %1707 = vrsqrt.f32 %v565_v42  ;;  %v1823_v42 = vmov 0  }
 0x2a8   : > { %1704 = vset.pattern.permute.xlu1 %v1823_v42  ;;  %1703 = vset.pattern.permute.xlu0 %v1823_v42 }
 0x2ad   : > { %v1706_v44 = vpop.eup %1705 }
 0x2ae   : > { %v568_v46 = vmul.f32 %v1706_v44, %v562_v43  ;;  %v962_v43 = vld [vmem:[%s341_s27 + $0x8] sm:$0xff]  ;;  %v961_v44 = vld [vmem:[%s341_s27] sm:$0xff] }
 0x2b0   : > { %v574_v49 = vmul.f32 %v1427_v45, %v568_v46  ;;  %v1450_v46 = vld [vmem:[%s2173_s4 + $0x48] sm:$0xff] }
 0x2b1   : > { %v1708_v50 = vpop.eup %1707 }
 0x2b2   : > { %v569_v51 = vmul.f32 %v1708_v50, %v563_v48  ;;  %v580_v52 = vadd.f32 %v1428_v47, %v574_v49 }
 0x2b4   : > { %v575_v53 = vmul.f32 %v1427_v45, %v569_v51  ;;  %1533 = vmatprep.mubr.msk.f32.mxu0 %vm536_vm2, %v580_v52  ;;  %v1449_v45 = vld [vmem:[%s2173_s4 + $0x40] sm:$0xff]  ;;  %v986_v52 = vld [vmem:[%s2174_s5 + $0x8] sm:$0xff] }
 0x2b5   : > { %v985_v51 = vld [vmem:[%s2174_s5] sm:$0xff] }
 0x2b6   : > { %v581_v54 = vadd.f32 %v1428_v47, %v575_v53  ;;  %v1629_v47 = vpack.c.bf16 %v1450_v46, %v1449_v45  ;;  %v1623_v53 = vpack.c.bf16 %v986_v52, %v985_v51 }
 0x2b8   : > { %1534 = vmatmul.mubr.msk.f32.vlgmr.msra.gmra.mrb[0].mxu0 %vm536_vm2, %v581_v54  ;;  %v1824_v54 = vmov 0.0|0.0  }
 0x2b9   : > { %1558 = vmatprep.mubr.msk.f32.mxu0 %vm452_vm1, %v2007_v3 }
 0x38b   : > { %v1535_v55 = vpop.f32.mrb[0].mxu0 }
 0x38c   : > { %v658_v56 = vpop.f32.mrb[1].mxu0 }
 0x38d   : > { %v1606_v57 = vpack.c.bf16 %v1535_v55, %v658_v56  ;;  %v987_v55 = vld [vmem:[%s2174_s5 + $0x10] sm:$0xff]  ;;  %v988_v56 = vld [vmem:[%s2174_s5 + $0x18] sm:$0x1f] }
 0x38f   : > { %1607 = vmatprep.subr.bf16.mxu1 %v1606_v57 }
 0x390   : > { %1609 = vmatpush3.bf16.msra.mxu1 %v1606_v57  ;;  %v1626_v57 = vpack.c.bf16 %v988_v56, %v987_v55 }
 0x391   : > { %1611 = vmatprep.subr.bf16.mxu1 %v1610_v11 }
 0x393   : > { %1541 = vmatmul.mubr.msk.f32.vlgmr.msra.gmra.mrb[4].mxu1 %vm452_vm1, %v2011_v7 }
 0x394   : > { %1613 = vmatpush3.bf16.msra.mxu1 %v1610_v11  ;;  %v1452_v11 = vld [vmem:[%s2173_s4 + $0x58] sm:$0xff] }
 0x395   : > { %1615 = vmatprep.subr.bf16.mxu1 %v1614_v13  ;;  %v1633_v12 = vpack.c.bf16 %v1452_v11, %v1451_v10 }
 0x398   : > { %1617 = vmatpush3.bf16.msra.mxu1 %v1614_v13  ;;  %v1442_v13 = vld [vmem:[%s2175_s6 + $0x2] ss:$0 sm:$0xff] }
 0x399   : > { %1630 = vmatprep.subr.bf16.mxu1 %v1629_v47 }
 0x466   : > { %v1542_v59 = vpop.f32.mrb[4].mxu1 }
 0x467   : > { %v743_v60 = vadd.f32 %v1542_v59, %v1431_v58  ;;  %v737_v61 = vpop.f32.mrb[5].mxu1 }
 0x468   : > { %v738_v62 = vadd.f32 %v1431_v58, %v737_v61  ;;  %v959_v58 = vlaneseq }
 0x469   : > { %v747_v63 = vmax.f32 %v743_v60, 0.0 }
 0x46a   : > { %v746_v0 = vmax.f32 %v738_v62, 0.0  ;;  %v2099_v59 = vand.u32 127, %v959_v58  ;;  %v1826_v62 = vmov 0.0  }
 0x46b   : > { %v751_v1 = vsel %vm536_vm2, %v747_v63, 0.0  ;;  %v757_v2 = vmul.f32 %v747_v63, %v747_v63 }
 0x46c   : > { %752 = vadd.xlane.f32.xlu1 %v751_v1  ;;  %v748_v3 = vsel %vm536_vm2, %v746_v0, 0.0  ;;  %v756_v4 = vmul.f32 %v746_v0, %v746_v0  ;;  %vm1263_vm11 = vcmp.lt.s32.totalorder %v2099_v59, 4 }
 0x46d   : > { %749 = vadd.xlane.f32.xlu0 %v748_v3  ;;  %v761_v5 = vsel %vm536_vm2, %v757_v2, 0.0 }
 0x46e   : > { %v758_v6 = vsel %vm536_vm2, %v756_v4, 0.0 }
 0x470   : > { %762 = vadd.xlane.f32.xlu1 %v761_v5 }
 0x471   : > { %759 = vadd.xlane.f32.xlu0 %v758_v6 }
 0x481   : > { %967 = vperm.xlu1 %1704, %v962_v43  }
 0x487   : > { %964 = vperm.xlu0 %1703, %v961_v44  }
 0x4f9   : > { %v753_v14 = vpop.xlane.xlu1 %752 }
 0x4fa   : > { %v755_v15 = vmul.f32 0.03125, %v753_v14  ;;  %v750_v16 = vpop.xlane.xlu0 %749 }
 0x4fb   : > { %v754_v17 = vmul.f32 0.03125, %v750_v16 }
 0x4fc   : > { %v767_v19 = vmul.f32 %v755_v15, %v755_v15  ;;  %v773_v30 = vsub.f32 %v747_v63, %v755_v15 }
 0x4fd   : > { %v763_v18 = vpop.xlane.xlu1 %762  ;;  %v766_v22 = vmul.f32 %v754_v17, %v754_v17  ;;  %v772_v32 = vsub.f32 %v746_v0, %v754_v17 }
 0x4fe   : > { %v765_v20 = vmul.f32 0.03125, %v763_v18  ;;  %v760_v21 = vpop.xlane.xlu0 %759 }
 0x4ff   : > { %v764_v23 = vmul.f32 0.03125, %v760_v21 }
 0x500   : > { %v769_v24 = vsub.f32 %v765_v20, %v767_v19 }
 0x501   : > { %v768_v25 = vsub.f32 %v764_v23, %v766_v22  ;;  %v968_v60 = vpop.permute.xlu1 %967  ;;  %v1456_v22 = vld [vmem:[%s2173_s4 + $0x60] sm:$0xff]  ;;  %v1457_v23 = vld [vmem:[%s2173_s4 + $0x68] sm:$0xff] }
 0x502   : > { %v771_v26 = vmax.f32 %v769_v24, 0.0  ;;  %vm970_vm6 = vcmp.eq.s32.totalorder %v2099_v59, %v968_v60  ;;  %v1637_v24 = vpack.c.bf16 %v1457_v23, %v1456_v22 }
 0x503   : > { %v770_v27 = vmax.f32 %v768_v25, 0.0  ;;  %v1446_v63 = vsel %vm970_vm6, 1.0, %v1826_v62  ;;  %v1458_v25 = vld [vmem:[%s2173_s4 + $0x70] sm:$0xff] }
 0x504   : > { %v775_v28 = vadd.f32 1e-05, %v771_v26  ;;  %v1459_v26 = vld [vmem:[%s2173_s4 + $0x78] sm:$0xff] }
 0x505   : > { %v774_v29 = vadd.f32 1e-05, %v770_v27  ;;  %v1641_v27 = vpack.c.bf16 %v1459_v26, %v1458_v25 }
 0x506   : > { %1709 = vrsqrt.f32 %v775_v28  ;;  %v965_v61 = vpop.permute.xlu0 %964  ;;  %v1157_v28 = vshrl.u32 %v959_v58, 7 }
 0x507   : > { %1711 = vrsqrt.f32 %v774_v29  ;;  %vm969_vm7 = vcmp.eq.s32.totalorder %v2099_v59, %v965_v61 }
 0x508   : > { %v1445_v0 = vsel %vm969_vm7, 1.0, %v1826_v62  ;;  %v1163_v29 = vsub.s32 0, %v1157_v28  ;;  %vm1159_vm10 = vcmp.eq.s32.totalorder %v1157_v28, 0 }
 0x509   : > { %v976_v1 = vsel %vm975_vm8, %v1445_v0, -inf }
 0x510   : > { %v1710_v31 = vpop.eup %1709 }
 0x511   : > { %v1712_v34 = vpop.eup %1711  ;;  %v779_v35 = vmul.f32 %v1710_v31, %v773_v30  ;;  %v1453_v30 = vld [vmem:[%s2175_s6 + $0x7] ss:$0 sm:$0xff] }
 0x512   : > { %v778_v36 = vmul.f32 %v1712_v34, %v772_v32 }
 0x513   : > { %v785_v38 = vmul.f32 %v1434_v33, %v779_v35 }
 0x514   : > { %v784_v39 = vmul.f32 %v1434_v33, %v778_v36 }
 0x515   : > { %v791_v41 = vadd.f32 %v1435_v37, %v785_v38  ;;  %v1460_v38 = vld [vmem:[%s2175_s6 + $0x8] ss:$0 sm:$0xff] }
 0x516   : > { %v790_v40 = vadd.f32 %v1435_v37, %v784_v39 }
 0x518   : > { %1551 = vmatprep.mubr.msk.f32.mxu1 %vm536_vm2, %v790_v40 }
 0x519   : > { %1552 = vmatmul.mubr.msk.f32.vlgmr.msra.gmra.mrb[6].mxu1 %vm536_vm2, %v791_v41 }
 0x51a   : > { %1632 = vmatpush3.bf16.msra.mxu1 %v1629_v47 }
 0x51b   : > { %1634 = vmatprep.subr.bf16.mxu1 %v1633_v12 }
 0x51e   : > { %1636 = vmatpush3.bf16.msra.mxu1 %v1633_v12 }
 0x5ec   : > { %v1553_v48 = vpop.f32.mrb[6].mxu1 }
 0x5ed   : > { %v869_v49 = vpop.f32.mrb[7].mxu1 }
 0x5ee   : > { %v1618_v50 = vpack.c.bf16 %v1553_v48, %v869_v49 }
 0x5f0   : > { %1619 = vmatprep.subr.bf16.mxu0 %v1618_v50 }
 0x5f1   : > { %1621 = vmatpush3.bf16.msra.mxu0 %v1618_v50 }
 0x5f2   : > { %1622 = vmatprep.subr.bf16.mxu0 %v1824_v54 }
 0x5f4   : > { %1559 = vmatmul.mubr.msk.f32.vlgmr.msra.gmra.mrb[2].mxu0 %vm452_vm1, %v2011_v7  ;;  %v977_v7 = vsel %vm975_vm8, %v1446_v63, -inf }
 0x5f5   : > { %1624 = vmatpush3.bf16.msra.mxu0 %v1623_v53  ;;  %v978_v2 = vmax.f32 %v976_v1, %v977_v7  ;;  %1569 = vmatprep.mubr.msk.f32.mxu0 %vm1827_vm9, %v1826_v62 }
 0x5f6   : > { %1625 = vmatprep.subr.bf16.mxu0 %v1824_v54 }
 0x5f7   : > { %v979_v3 = vrot.slane %v978_v2, 4 }
 0x5f9   : > { %1628 = vmatpush3.bf16.msk.msra.mxu0 %vm1627_vm5, %v1626_v57  ;;  %v980_v4 = vmax.f32 %v978_v2, %v979_v3 }
 0x5fa   : > { %1638 = vmatprep.subr.bf16.mxu0 %v1637_v24 }
 0x5fb   : > { %v981_v5 = vrot.slane %v980_v4, 2 }
 0x5fd   : > { %v982_v6 = vmax.f32 %v980_v4, %v981_v5 }
 0x5ff   : > { %v983_v8 = vrot.slane %v982_v6, 1 }
 0x601   : > { %v984_v9 = vmax.f32 %v982_v6, %v983_v8 }
 0x603   : > { %1570 = vmatmul.mubr.msk.f32.vlgmr.msra.gmra.mrb[4].mxu0 %vm975_vm8, %v984_v9 }
 0x604   : > { %1640 = vmatpush3.bf16.msra.mxu0 %v1637_v24 }
 0x605   : > { %1642 = vmatprep.subr.bf16.mxu0 %v1641_v27 }
 0x608   : > { %1644 = vmatpush3.bf16.msra.mxu0 %v1641_v27 }
 0x6c7   : > { %v1560_v14 = vpop.f32.mrb[2].mxu0 }
 0x6c8   : > { %v2115_v15 = vadd.f32 %v1560_v14, %v1442_v13  ;;  %v948_v16 = vpop.f32.mrb[3].mxu0 }
 0x6c9   : > { %v2117_v17 = vadd.f32 %v1442_v13, %v948_v16 }
 0x6ca   : > { %v958_v19 = vmax.f32 %v2115_v15, 0.0 }
 0x6cb   : > { %v957_v18 = vmax.f32 %v2117_v17, 0.0 }
 0x6cd   : > { %1580 = vmatprep.mubr.msk.f32.mxu1 %vm536_vm2, %v957_v18 }
 0x6ce   : > { %1581 = vmatmul.mubr.msk.f32.vlgmr.msra.gmra.mrb[8].mxu1 %vm536_vm2, %v958_v19 }
 0x6d6   : > { %v1062_v20 = vpop.f32.mrb[4].mxu0 }
 0x6d7   : > { %v1571_v21 = vpop.f32.mrb[5].mxu0  ;;  %v1164_v33 = vrot.slane %v1062_v20, %v1163_v29 }
 0x7a1   : > { %v1582_v31 = vpop.f32.mrb[8].mxu1 }
 0x7a2   : > { %v1147_v32 = vpop.f32.mrb[9].mxu1  ;;  %v1153_v36 = vadd.f32 %v1582_v31, %v1453_v30 }
 0x7a3   : > { %v1148_v34 = vadd.f32 %v1453_v30, %v1147_v32 }
 0x7a5   : > { %v1165_v35 = vadd.f32 %v1164_v33, %v1148_v34 }
 0x7a7   : > { %v1171_v37 = vsel %vm1159_vm10, %v1165_v35, %v1148_v34 }
 0x7a8   : > { %1591 = vmatprep.mubr.msk.f32.mxu0 %vm536_vm2, %v1171_v37 }
 0x7a9   : > { %1592 = vmatmul.mubr.msk.f32.vlgmr.msra.gmra.mrb[6].mxu0 %vm536_vm2, %v1153_v36 }
 0x87c   : > { %v1593_v39 = vpop.f32.mrb[6].mxu0 }
 0x87d   : > { %v1260_v40 = vadd.f32 %v1593_v39, %v1460_v38  ;;  %v1254_v41 = vpop.f32.mrb[7].mxu0 }
 0x87e   : > { %v1255_v42 = vadd.f32 %v1460_v38, %v1254_v41 }
 0x87f   : > { %v1265_v43 = vsel %vm1263_vm11, %v1260_v40, -1e+30 }
 0x880   : > { %v1269_v44 = vsel %vm536_vm2, %v1265_v43, -inf  ;;  %v1264_v45 = vsel %vm1263_vm11, %v1255_v42, -1e+30 }
 0x881   : > { %1270 = vmax.xlane.f32.xlu0 %v1269_v44  ;;  %v1266_v46 = vsel %vm536_vm2, %v1264_v45, -inf }
 0x882   : > { %1267 = vmax.xlane.f32.xlu1 %v1266_v46 }
 0x90e   : > { %v1271_v47 = vpop.xlane.xlu0 %1270 }
 0x90f   : > { %v1273_v48 = vsub.f32 %v1265_v43, %v1271_v47  ;;  %v1268_v49 = vpop.xlane.xlu1 %1267 }
 0x910   : > { %v1272_v50 = vsub.f32 %v1264_v45, %v1268_v49 }
 0x911   : > { %v1276_v51 = vmul.f32 1.442695, %v1273_v48 }
 0x912   : > { %v1274_v52 = vmul.f32 1.442695, %v1272_v50 }
 0x914   : > { %1713 = vpow2.f32 %v1274_v52 }
 0x915   : > { %1715 = vpow2.f32 %v1276_v51 }
 0x91e   : > { %v1714_v53 = vpop.eup %1713 }
 0x91f   : > { %v1278_v54 = vsel %vm536_vm2, %v1714_v53, 0.0  ;;  %v1716_v55 = vpop.eup %1715 }
 0x920   : > { %1279 = vadd.xlane.f32.xlu1 %v1278_v54  ;;  %v1281_v56 = vsel %vm536_vm2, %v1716_v55, 0.0 }
 0x924   : > { %1282 = vadd.xlane.f32.xlu1 %v1281_v56 }
 0x9ad   : > { %v1280_v57 = vpop.xlane.xlu1 %1279 }
 0x9ae   : > { %1717 = vlog2.f32 %v1280_v57 }
 0x9b1   : > { %v1283_v58 = vpop.xlane.xlu1 %1282 }
 0x9b2   : > { %1719 = vlog2.f32 %v1283_v58 }
 0x9b8   : > { %v1718_v59 = vpop.eup %1717 }
 0x9b9   : > { %v1285_v60 = vmul.f32 0.6931472, %v1718_v59 }
 0x9bb   : > { %v1288_v61 = vsub.f32 %v1272_v50, %v1285_v60 }
 0x9bc   : > { %v1720_v62 = vpop.eup %1719 }
 0x9bd   : > { %v1287_v63 = vmul.f32 0.6931472, %v1720_v62  ;;  %1292 = vrot.lane.b32.xlu1 %v1288_v61, %s1828_s19 }
 0x9bf   : > { %v1289_v0 = vsub.f32 %v1273_v48, %v1287_v63 }
 0x9c1   : > { %1294 = vrot.lane.b32.xlu0 %v1289_v0, %s1828_s19 }
 0xa2f   : > { %v1293_v7 = vpop.permute.xlu1 %1292 }
 0xa30   : > { %v1298_v1 = vsel %vm536_vm2, %v2117_v17, %v1293_v7 }
 0xa31   : > { %v1301_v2 = vsel %vm1300_vm12, %v1298_v1, 0.0 }
 0xa32   : > { %1303 = vst [vmem:[%s351_s23] sm:$0xff] %v1301_v2 }
 0xa33   : > { %v1295_v3 = vpop.permute.xlu0 %1294 }
 0xa34   : > { %v1299_v4 = vsel %vm536_vm2, %v2115_v15, %v1295_v3 }
 0xa35   : > { %v1302_v5 = vsel %vm1300_vm12, %v1299_v4, 0.0 }
 0xa36   : > { %1304 = vst [vmem:[%s351_s23 + $0x8] sm:$0xff] %v1302_v5 }
 0xa37 PF: > { %p18_p4 = scmp.ge.s32.totalorder %s1891_s29, 6   ;;  %s2191_s24 = smov %s1809_s25 }
 0xa38   : > { %s2192_s25 = smov %s1813_s26  ;;  %s2193_s26 = smov %s1901_s9 }
 0xa39   : > { %s2194_s27 = smov %s1891_s29  ;;  %20 = sbr.rel (!%p18_p4) target bundleno = 4 (0x4), region = 101 }
 0xa40   :  { %1326 = vsyncpa [#allocation3], 1 }
 0xa41   :  { %1328 = vsyncpa [#allocation3 + $0x1], 1 }
 0xa42   :  { %1329 = vsyncpa [#allocation5], 1 }

</bundles_post_ra>
